<compile_context>
chip_gen: v7x
topology: tpu7x:2x2x1
jax: 0.10.0
libtpu: 0.0.40
codegen_flags: <defaults>
</compile_context>

<pallas_src>
import math

import jax
import jax.numpy as jnp
from jax.experimental import pallas as pl
from jax.experimental.pallas import tpu as pltpu

_LANE_W = 512       # lane-dense last dim (multiple of 128)
_MAX_TM = 1024      # row-tile cap: (1024, 512) f32 = 2 MiB per buffer


def _exp_multiplier_kernel(t_ref, x_ref, o_ref):
    # t_ref: (1, 1) scalar parameter in SMEM; x_ref/o_ref: (tm, W) VMEM tiles.
    scale = jnp.exp(t_ref[0, 0].astype(jnp.float32))
    o_ref[...] = (x_ref[...] * scale).astype(o_ref.dtype)


def exp_multiplier(x, t):
    """Forward of ExpMultiplier: x * exp(t). x: any-shaped float array, t: scalar."""
    orig_shape = x.shape
    orig_dtype = x.dtype

    total = math.prod(orig_shape) if orig_shape else 1
    rows = pl.cdiv(total, _LANE_W)
    tm = min(_MAX_TM, rows)
    rows_padded = pl.cdiv(rows, tm) * tm
    padded_total = rows_padded * _LANE_W

    x_flat = x.reshape(-1)
    pad = padded_total - total
    if pad:
        x_flat = jnp.pad(x_flat, (0, pad))
    x2d = x_flat.reshape(rows_padded, _LANE_W)

    t2d = jnp.asarray(t, dtype=jnp.float32).reshape(1, 1)

    grid = (rows_padded // tm,)

    out2d = pl.pallas_call(
        _exp_multiplier_kernel,
        out_shape=jax.ShapeDtypeStruct(x2d.shape, orig_dtype),
        grid_spec=pl.GridSpec(
            grid=grid,
            in_specs=[
                pl.BlockSpec((1, 1), lambda i: (0, 0),
                             memory_space=pltpu.SMEM),
                pl.BlockSpec((tm, _LANE_W), lambda i: (i, 0)),
            ],
            out_specs=pl.BlockSpec((tm, _LANE_W), lambda i: (i, 0)),
        ),
        compiler_params=pltpu.CompilerParams(
            dimension_semantics=("parallel",),
        ),
    )(t2d, x2d)

    out_flat = out2d.reshape(-1)
    if pad:
        out_flat = out_flat[:total]
    return out_flat.reshape(orig_shape)


if __name__ == "__main__":
    key = jax.random.PRNGKey(0)

    # Small NCHW input consistent with a generic forward pass.
    x = jax.random.normal(key, (2, 4, 16, 16), dtype=jnp.float32)

    # Deterministic parameter init matching nn.Parameter(torch.tensor(0.0)).
    initial_value = 0.0
    t = jnp.float32(initial_value)

    y = exp_multiplier(x, t)
    y = jax.block_until_ready(y)

    # Reference check (plain JAX).
    y_ref = x * jnp.exp(t)
    assert y.shape == x.shape and y.dtype == x.dtype
    assert jnp.allclose(y, y_ref, atol=1e-6, rtol=1e-6)

    # Extra check: non-divisible total + nonzero t exercises padding path.
    key2 = jax.random.PRNGKey(1)
    x2 = jax.random.normal(key2, (3, 5, 7, 9), dtype=jnp.float32)
    t2 = jnp.float32(0.37)
    y2 = jax.block_until_ready(exp_multiplier(x2, t2))
    assert y2.shape == x2.shape and y2.dtype == x2.dtype
    assert jnp.allclose(y2, x2 * jnp.exp(t2), atol=1e-5, rtol=1e-5)

    print("KERNEL_OK")
</pallas_src>

<mosaic_0001>
module attributes {stable_mosaic.version = 11 : i64} {
  func.func @_exp_multiplier_kernel(%arg0: i32, %arg1: memref<1x1xf32, #tpu.memory_space<smem>>, %arg2: memref<4x512xf32, #tpu.memory_space<vmem>>, %arg3: memref<4x512xf32, #tpu.memory_space<vmem>>) attributes {dimension_semantics = [#tpu.dimension_semantics<parallel>], iteration_bounds = array<i64: 1>, scalar_prefetch = 0 : i64, scratch_operands = 0 : i64, tpu.core_type = #tpu.core_type<tc>, window_params = [{transform_indices = @transform_0, window_bounds = array<i64: 1, 1>}, {transform_indices = @transform_1, window_bounds = array<i64: 4, 512>}, {transform_indices = @transform_2, window_bounds = array<i64: 4, 512>}]} {
    %c0 = arith.constant 0 : index
    %c0_0 = arith.constant 0 : index
    %0 = memref.load %arg1[%c0, %c0_0] : memref<1x1xf32, #tpu.memory_space<smem>>
    %1 = math.exp %0 : f32
    %c0_1 = arith.constant 0 : index
    %c0_2 = arith.constant 0 : index
    %2 = vector.load %arg2[%c0_1, %c0_2] : memref<4x512xf32, #tpu.memory_space<vmem>>, vector<4x512xf32>
    %3 = vector.broadcast %1 : f32 to vector<4x512xf32>
    %4 = arith.mulf %2, %3 : vector<4x512xf32>
    %c0_3 = arith.constant 0 : index
    %c0_4 = arith.constant 0 : index
    %5 = vector.load %arg3[%c0_3, %c0_4] : memref<4x512xf32, #tpu.memory_space<vmem>>, vector<4x512xf32>
    tpu.vector_store %arg3[%c0_3, %c0_4], %4 {strides = array<i32>} : memref<4x512xf32, #tpu.memory_space<vmem>>, vector<4x512xf32>,
    return
  }
  func.func @transform_0(%arg0: i32) -> (i32, i32) {
    %c0_i32 = arith.constant 0 : i32
    %c0_i32_0 = arith.constant 0 : i32
    %c0_i32_1 = arith.constant 0 : i32
    return %c0_i32, %c0_i32_0 : i32, i32
  }
  func.func @transform_1(%arg0: i32) -> (i32, i32) {
    %c0_i32 = arith.constant 0 : i32
    %c0_i32_0 = arith.constant 0 : i32
    return %arg0, %c0_i32 : i32, i32
  }
  func.func @transform_2(%arg0: i32) -> (i32, i32) {
    %c0_i32 = arith.constant 0 : i32
    %c0_i32_0 = arith.constant 0 : i32
    return %arg0, %c0_i32 : i32, i32
  }
}

</mosaic_0001>

<bundles_post_ra>
// kernel: tpu_custom_call.1
= control target key start
LH: loop header
LB: loop body
LE: loop exit
PB: predicated region body
PF: predicated region fallthrough
CT: control target
= control target key end

     0   :  { %8 = vsyncpa [#allocation4], 0  ;;  %s150_s0 = inlined_call_operand.<no memory space> [shape: f32[1,1], index: 0, kind: input, shape index: {}]   ;;  %s151_s1 = inlined_call_operand.hbm [shape: f32[4,512], index: 1, kind: input, shape index: {}]   ;;  %s152_s2 = inlined_call_operand.hbm [shape: f32[4,512], index: 2, kind: output, shape index: {}]  }
   0x1   :  { %9 = vsyncpa [#allocation5], 0  ;;  %s106_s9 = smov [#allocation3]   ;;  %s58_s13 = scalar_lea.hbm %s151_s1, 256 }
   0x2   :  { %s18_s10 = sshll.u32 %s106_s9, 4  ;;  %p59_p0 = scmp.ne.s32.totalorder %s151_s1, %s58_s13  ;;  %s19_s10 = int_to_ptr.vmem [resolvable:$true] %s18_s10 }
   0x3   :  { %p62_p1 = scmp.lt.u32.totalorder %s58_s13, %s151_s1 }
   0x5   :  { %p64_p2 = pnand %p62_p1, %p59_p0 }
   0x7   :  { %67 = shalt.err (!%p64_p2)
}
   0x8   :  { %s68_s18 = scalar_lea.vmem %s19_s10, 256  ;;  %p73_p4 = scmp.lt.s32.totalorder %s19_s10, %s19_s10 }
   0x9   :  { %p69_p3 = scmp.ne.s32.totalorder %s19_s10, %s68_s18  ;;  %p74_p5 = scmp.lt.s32.totalorder %s68_s18, %s68_s18 }
   0xb   :  { %p75_p6 = por %p74_p5, %p73_p4 }
   0xd   :  { %p76_p7 = pnand %p75_p6, %p69_p3 }
   0xf   :  { %79 = shalt.err (!%p76_p7)
}
  0x10   :  { %21 = dma.hbm_to_vmem [thread:$0]  %s151_s1, 256, %s19_s10, [#allocation4]   ;;  %v26_v0 = vstv %s150_s0 }
  0x11   :  { %102 = dma.done.wait [#allocation4], 256  }
  0x12   :  { %103 = vsyncadd [#allocation4], 4294967040  ;;  %v27_v1 = vmul.f32 1.442695, %v26_v0  ;;  %v30_v3 = vld [vmem:[#allocation3] sm:$0xff]  ;;  %v31_v4 = vld [vmem:[#allocation3 + $0x8] sm:$0xff] }
  0x13   :  { %s107_s23 = smov [#allocation6]  }
  0x14   :  { %56 = vpow2.f32 %v27_v1  ;;  %s43_s24 = sshll.u32 %s107_s23, 4  ;;  %s44_s24 = int_to_ptr.vmem [resolvable:$true] %s43_s24 }
  0x15   :  { %s80_s1 = scalar_lea.vmem %s44_s24, 256  ;;  %p85_p9 = scmp.lt.s32.totalorder %s44_s24, %s44_s24 }
  0x16   :  { %p81_p8 = scmp.ne.s32.totalorder %s44_s24, %s80_s1  ;;  %p86_p10 = scmp.lt.s32.totalorder %s80_s1, %s80_s1 }
  0x18   :  { %p87_p11 = por %p86_p10, %p85_p9 }
  0x1a   :  { %p88_p12 = pnand %p87_p11, %p81_p8 }
  0x1e   :  { %v57_v2 = vpop.eup %56 }
  0x1f   :  { %52 = vpush %v57_v2 }
  0x50   :  { %s53_s25 = spop %52 }
  0x51   :  { %v32_v5 = vstv %s53_s25 }
  0x52   :  { %v33_v6 = vmul.f32 %v32_v5, %v30_v3  ;;  %v34_v7 = vmul.f32 %v32_v5, %v31_v4 }
  0x54   :  { %35 = vst [vmem:[#allocation6] sm:$0xff] %v33_v6  ;;  %36 = vst [vmem:[#allocation6 + $0x8] sm:$0xff] %v34_v7 }
  0x55   :  { %91 = shalt.err (!%p88_p12)
}
  0x56   :  { %s92_s27 = scalar_lea.hbm %s152_s2, 256 }
  0x57   :  { %p93_p13 = scmp.ne.s32.totalorder %s152_s2, %s92_s27  ;;  %p96_p0 = scmp.lt.u32.totalorder %s92_s27, %s152_s2 }
  0x59   :  { %p98_p1 = pnand %p96_p0, %p93_p13 }
  0x5b   :  { %101 = shalt.err (!%p98_p1)
}
  0x5c   :  { %46 = dma.vmem_to_hbm [thread:$0]  %s44_s24, 256, %s152_s2, [#allocation5]  }
  0x5d   :  { %104 = dma.done.wait [#allocation5], 256  }
  0x5e   :  { %105 = vsyncadd [#allocation5], 4294967040 }
  0x5f   :  { %50 = vsyncpa [#allocation4], 1 }
  0x60   :  { %51 = vsyncpa [#allocation5], 1 }

</bundles_post_ra>
